<compile_context>
chip_gen: v6e
topology: v6e:2x2x1
jax: 0.10.0
libtpu: 0.0.40
codegen_flags: <defaults>
</compile_context>

<pallas_src>
import math

import jax
import jax.numpy as jnp
import numpy as np
from jax import lax
from jax.experimental import pallas as pl
from jax.experimental.pallas import tpu as pltpu  # noqa: F401  (TPU backend)

# ---------------- config (small synthetic shapes) ----------------
CFG = dict(emb_dim=32, context_length=8, n_heads=4, drop_rate=0.0, qkv_bias=False)
B = 2
L = CFG["context_length"]
D = CFG["emb_dim"]
H = CFG["n_heads"]
HD = D // H
NK = D            # num_kernels = 1 * emb_dim
BL = B * L        # folded batch*sequence rows
EPS = 1e-5
NEG_BIG = -1e30   # large finite negative (avoids inf-inf NaN hazard)
SCALE = 1.0 / math.sqrt(HD)


def _layernorm(x, scale, shift):
    # one-pass stats: mean and E[x^2] are independent lane reductions
    mean = jnp.mean(x, axis=-1, keepdims=True)
    m2 = jnp.mean(x * x, axis=-1, keepdims=True)
    var = m2 - mean * mean                                   # unbiased=False
    return (x - mean) * lax.rsqrt(var + EPS) * scale + shift


# ---------------- Pallas kernel (single invocation, no grid) ----------------
def transformer_block_rbf_kernel(
    x_ref,        # (BL, D)   f32
    ln1_s_ref,    # (1, D)    f32
    ln1_b_ref,    # (1, D)    f32
    wqkv_ref,     # (D, 3D)   bf16  packed (Wq*SCALE)|Wk|Wv, "x @ W" form
    wo_ref,       # (D, D)    bf16
    bo_ref,       # (1, D)    f32
    ln2_s_ref,    # (1, D)    f32
    ln2_b_ref,    # (1, D)    f32
    hm_ref,       # (H*BL, D) f32   0/1 head-fold mask
    bias_ref,     # (H*BL, BL) f32  additive attention mask (0 valid / -1e30 invalid)
    cs_ref,       # (NK, D)   bf16  centers * inv_ls / sqrt(2)
    c2_ref,       # (1, NK)   f32   sum(cs_f32^2, -1)
    inv_ls_ref,   # (1, D)    f32   inv_ls / sqrt(2)
    wff_ref,      # (NK, D)   bf16
    bff_ref,      # (1, D)    f32
    o_ref,        # (BL, D)
):
    x = x_ref[...].astype(jnp.float32)                          # (BL, D)

    # ---- LayerNorm 1 ----
    h1 = _layernorm(x, ln1_s_ref[...], ln1_b_ref[...])

    # ---- fused QKV projection: one (BL,D)x(D,3D) MXU op, bf16 operands / f32 accumulate ----
    qkv = jnp.dot(h1.astype(jnp.bfloat16), wqkv_ref[...],
                  preferred_element_type=jnp.float32)            # (BL, 3D)
    q = qkv[:, 0:D]            # already scaled by 1/sqrt(HD) via wqkv preprocessing
    k = qkv[:, D:2 * D]
    v = qkv[:, 2 * D:3 * D]

    # ---- multi-head causal self-attention, heads folded into the row dim ----
    hm = hm_ref[...]                                             # (H*BL, D) 0/1
    # Q_big[h*BL+n, :] = q[n, :] restricted to head h's HD columns (zeros elsewhere)
    q_big = jnp.tile(q, (H, 1)) * hm                             # (H*BL, D)

    # scores for every (head, query) row against every key — one matmul, 'nd,md->nm'
    s = lax.dot_general(q_big.astype(jnp.bfloat16), k.astype(jnp.bfloat16),
                        (((1,), (1,)), ((), ())),
                        preferred_element_type=jnp.float32)      # (H*BL, BL)
    s = s + bias_ref[...]      # block-diagonal(batch) AND causal additive mask

    # row softmax (every row has at least its diagonal valid)
    s = s - jnp.max(s, axis=-1, keepdims=True)
    p = jnp.exp(s)
    p = p * pl.reciprocal(jnp.sum(p, axis=-1, keepdims=True), approx=True)

    # context: one matmul produces every head-block applied to all value columns;
    # keep each head's own HD columns (mask multiply) and fold H row-blocks back to (BL, D).
    ctx_all = jnp.dot(p.astype(jnp.bfloat16), v.astype(jnp.bfloat16),
                      preferred_element_type=jnp.float32) * hm   # (H*BL, D)
    ctx = ctx_all[0:BL]
    for hh in range(1, H):                                       # 3 cheap tile adds
        ctx = ctx + ctx_all[hh * BL:(hh + 1) * BL]               # (BL, D)

    attn = jnp.dot(ctx.astype(jnp.bfloat16), wo_ref[...],
                   preferred_element_type=jnp.float32) + bo_ref[...]
    x = x + attn                                   # residual 1 (dropout = identity)

    # ---- LayerNorm 2 ----
    h2 = _layernorm(x, ln2_s_ref[...], ln2_b_ref[...])

    # ---- GPyTorch-style RBF kernel FFN; -0.5 folded into the 1/sqrt(2)-scaled params ----
    xs = h2 * inv_ls_ref[...]                                    # (BL, D)  f32
    x2 = jnp.sum(xs * xs, axis=-1, keepdims=True)                # (BL, 1)
    cross = lax.dot_general(xs.astype(jnp.bfloat16), cs_ref[...],
                            (((1,), (1,)), ((), ())),
                            preferred_element_type=jnp.float32)  # (BL, NK)
    sq = jnp.maximum(x2 + c2_ref[...] - 2.0 * cross, 0.0)
    kfeat = jnp.exp(-sq)                                         # == exp(-0.5 * d^2)
    ff = jnp.dot(kfeat.astype(jnp.bfloat16), wff_ref[...],
                 preferred_element_type=jnp.float32) + bff_ref[...]

    o_ref[...] = (x + ff).astype(o_ref.dtype)      # residual 2


# ---------------- wrapper ----------------
def transformer_block_rbf(x, params):
    (ln1_s, ln1_b, wq, wk, wv, wo, bo,
     ln2_s, ln2_b, centers, inv_ls, wff, bff) = params

    Bx, Lx, Dx = x.shape
    BLx = Bx * Lx
    x2d = x.reshape(BLx, Dx)

    # ---- parameter-only preprocessing (computed once, outside the kernel) ----
    # fused QKV with the 1/sqrt(head_dim) score scale folded into the Q columns; bf16 weights
    wqkv = jnp.concatenate([wq * SCALE, wk, wv], axis=1).astype(jnp.bfloat16)   # (D, 3D)
    wo_b = wo.astype(jnp.bfloat16)
    # RBF: fold the -0.5 of exp(-0.5 d^2) into the ARD scaling (1/sqrt(2) on both operands)
    inv_ls_h = (inv_ls * (1.0 / np.sqrt(2.0))).astype(jnp.float32)              # (1, D)
    cs_f32 = centers * inv_ls_h                                                 # (NK, D)
    c2 = jnp.sum(cs_f32 * cs_f32, axis=-1, keepdims=True).T                     # (1, NK)
    cs = cs_f32.astype(jnp.bfloat16)
    wff_b = wff.astype(jnp.bfloat16)

    # ---- static masks (compile-time constant; removes all in-kernel iota / div / mod) ----
    rows = np.arange(H * BLx)
    hm = ((rows[:, None] // BLx) == (np.arange(Dx)[None, :] // HD)).astype(np.float32)
    n = rows % BLx                      # query flat index
    m = np.arange(BLx)                  # key flat index
    valid = ((n[:, None] // Lx) == (m[None, :] // Lx)) & ((m[None, :] % Lx) <= (n[:, None] % Lx))
    attn_bias = np.where(valid, 0.0, NEG_BIG).astype(np.float32)
    hm = jnp.asarray(hm)
    attn_bias = jnp.asarray(attn_bias)

    args = (x2d, ln1_s, ln1_b, wqkv, wo_b, bo, ln2_s, ln2_b,
            hm, attn_bias, cs, c2, inv_ls_h, wff_b, bff)

    # advisory cost estimate so XLA schedules surrounding work around the custom call
    flops = (2 * BLx * Dx * 3 * Dx            # fused QKV
             + 2 * (H * BLx) * Dx * BLx       # scores
             + 2 * (H * BLx) * BLx * Dx       # context
             + 2 * BLx * Dx * Dx              # out proj
             + 2 * BLx * Dx * NK              # RBF cross term
             + 2 * BLx * NK * Dx)             # FFN out
    transcendentals = H * BLx * BLx + BLx * NK + 2 * BLx
    bytes_accessed = int(sum(int(a.size) * a.dtype.itemsize for a in args)
                         + BLx * Dx * x.dtype.itemsize)

    out2d = pl.pallas_call(
        transformer_block_rbf_kernel,
        out_shape=jax.ShapeDtypeStruct((BLx, Dx), x.dtype),
        cost_estimate=pl.CostEstimate(flops=flops,
                                      transcendentals=transcendentals,
                                      bytes_accessed=bytes_accessed),
        # no grid / no BlockSpecs: whole problem resident in VMEM, single kernel step
        # (at B*L=16, D=32 the call is pure launch overhead; amortize by folding more
        #  batch / layers per call before adding a parallel grid axis for v7x megacore)
    )(*args)

    return out2d.reshape(Bx, Lx, Dx)


# ---------------- pure-JAX reference (for verification) ----------------
def reference(x, params):
    (ln1_s, ln1_b, wq, wk, wv, wo, bo,
     ln2_s, ln2_b, centers, inv_ls, wff, bff) = params

    def layernorm(x, s, b):
        mm = x.mean(-1, keepdims=True)
        vv = ((x - mm) ** 2).mean(-1, keepdims=True)
        return s[0] * (x - mm) / jnp.sqrt(vv + EPS) + b[0]

    h = layernorm(x, ln1_s, ln1_b)
    q = (h @ wq).reshape(B, L, H, HD).transpose(0, 2, 1, 3)
    k = (h @ wk).reshape(B, L, H, HD).transpose(0, 2, 1, 3)
    v = (h @ wv).reshape(B, L, H, HD).transpose(0, 2, 1, 3)
    s = jnp.einsum("bhqd,bhkd->bhqk", q, k) / math.sqrt(HD)
    mask = jnp.triu(jnp.ones((L, L), bool), 1)
    s = jnp.where(mask, -jnp.inf, s)
    p = jax.nn.softmax(s, axis=-1)
    ctx = jnp.einsum("bhqk,bhkd->bhqd", p, v).transpose(0, 2, 1, 3).reshape(B, L, D)
    x = x + ctx @ wo + bo[0]

    h2 = layernorm(x, ln2_s, ln2_b)
    xs = h2 * inv_ls[0]
    cs = centers * inv_ls[0]
    sq = (jnp.sum(xs * xs, -1, keepdims=True)
          + jnp.sum(cs * cs, -1)[None, None, :]
          - 2.0 * jnp.einsum("bld,nd->bln", xs, cs))
    kmat = jnp.exp(-0.5 * jnp.maximum(sq, 0.0))
    return x + kmat @ wff + bff[0]


if __name__ == "__main__":
    key = jax.random.PRNGKey(0)
    keys = jax.random.split(key, 10)

    x = jax.random.normal(keys[0], (B, L, D), jnp.float32)

    # deterministic parameter init (synthetic; not a checkpoint load)
    ln1_s = jnp.ones((1, D), jnp.float32)
    ln1_b = jnp.zeros((1, D), jnp.float32)
    ln2_s = jnp.ones((1, D), jnp.float32)
    ln2_b = jnp.zeros((1, D), jnp.float32)
    wq = jax.random.normal(keys[1], (D, D), jnp.float32) * 0.1   # already [in, out]
    wk = jax.random.normal(keys[2], (D, D), jnp.float32) * 0.1
    wv = jax.random.normal(keys[3], (D, D), jnp.float32) * 0.1
    wo = jax.random.normal(keys[4], (D, D), jnp.float32) * 0.1
    bo = jax.random.normal(keys[5], (1, D), jnp.float32) * 0.1
    centers = jax.random.normal(keys[6], (NK, D), jnp.float32) * 0.1
    lengthscale = jnp.full((1, D), math.log(2.0), jnp.float32)   # softplus(0), gpytorch default
    inv_ls = 1.0 / lengthscale
    wff = jax.random.normal(keys[7], (NK, D), jnp.float32) * 0.1  # [num_kernels, emb_dim]
    bff = jax.random.normal(keys[8], (1, D), jnp.float32) * 0.1

    params = (ln1_s, ln1_b, wq, wk, wv, wo, bo,
              ln2_s, ln2_b, centers, inv_ls, wff, bff)

    out = transformer_block_rbf(x, params)
    out = jax.block_until_ready(out)

    ref = reference(x, params)
    # Tolerance reflects bf16 MXU operands (rel err ~2^-9 per operand across a chain of six
    # matmuls) plus the approximate EUP reciprocal in the softmax denominator.  Typical
    # element-wise error is ~1e-2; structural errors (wrong mask / head mapping / LayerNorm)
    # would be >> 1e-1 and are still caught.
    np.testing.assert_allclose(np.asarray(out), np.asarray(ref), rtol=5e-2, atol=5e-2)

    print("KERNEL_OK")
</pallas_src>

<mosaic_0001>
module attributes {stable_mosaic.version = 11 : i64} {
  func.func @transformer_block_rbf_kernel(%arg0: memref<16x32xf32, #tpu.memory_space<vmem>>, %arg1: memref<1x32xf32, #tpu.memory_space<vmem>>, %arg2: memref<1x32xf32, #tpu.memory_space<vmem>>, %arg3: memref<32x96xbf16, #tpu.memory_space<vmem>>, %arg4: memref<32x32xbf16, #tpu.memory_space<vmem>>, %arg5: memref<1x32xf32, #tpu.memory_space<vmem>>, %arg6: memref<1x32xf32, #tpu.memory_space<vmem>>, %arg7: memref<1x32xf32, #tpu.memory_space<vmem>>, %arg8: memref<64x32xf32, #tpu.memory_space<vmem>>, %arg9: memref<64x16xf32, #tpu.memory_space<vmem>>, %arg10: memref<32x32xbf16, #tpu.memory_space<vmem>>, %arg11: memref<1x32xf32, #tpu.memory_space<vmem>>, %arg12: memref<1x32xf32, #tpu.memory_space<vmem>>, %arg13: memref<32x32xbf16, #tpu.memory_space<vmem>>, %arg14: memref<1x32xf32, #tpu.memory_space<vmem>>, %arg15: memref<16x32xf32, #tpu.memory_space<vmem>>) attributes {dimension_semantics = [], scalar_prefetch = 0 : i64, scratch_operands = 0 : i64, tpu.core_type = #tpu.core_type<tc>} {
    %c0 = arith.constant 0 : index
    %c0_0 = arith.constant 0 : index
    %0 = vector.load %arg0[%c0, %c0_0] : memref<16x32xf32, #tpu.memory_space<vmem>>, vector<16x32xf32>
    %c0_1 = arith.constant 0 : index
    %c0_2 = arith.constant 0 : index
    %1 = vector.load %arg1[%c0_1, %c0_2] : memref<1x32xf32, #tpu.memory_space<vmem>>, vector<1x32xf32>
    %c0_3 = arith.constant 0 : index
    %c0_4 = arith.constant 0 : index
    %2 = vector.load %arg2[%c0_3, %c0_4] : memref<1x32xf32, #tpu.memory_space<vmem>>, vector<1x32xf32>
    %cst = arith.constant dense<0.000000e+00> : vector<16xf32>
    %3 = vector.multi_reduction <add>, %0, %cst [1] : vector<16x32xf32> to vector<16xf32>
    %4 = vector.shape_cast %3 : vector<16xf32> to vector<16x1xf32>
    %cst_5 = arith.constant 3.200000e+01 : f32
    %5 = vector.broadcast %cst_5 : f32 to vector<16x1xf32>
    %6 = arith.divf %4, %5 : vector<16x1xf32>
    %7 = arith.mulf %0, %0 : vector<16x32xf32>
    %cst_6 = arith.constant dense<0.000000e+00> : vector<16xf32>
    %8 = vector.multi_reduction <add>, %7, %cst_6 [1] : vector<16x32xf32> to vector<16xf32>
    %9 = vector.shape_cast %8 : vector<16xf32> to vector<16x1xf32>
    %cst_7 = arith.constant 3.200000e+01 : f32
    %10 = vector.broadcast %cst_7 : f32 to vector<16x1xf32>
    %11 = arith.divf %9, %10 : vector<16x1xf32>
    %12 = arith.mulf %6, %6 : vector<16x1xf32>
    %13 = arith.subf %11, %12 : vector<16x1xf32>
    %14 = vector.broadcast %6 : vector<16x1xf32> to vector<16x32xf32>
    %15 = arith.subf %0, %14 : vector<16x32xf32>
    %cst_8 = arith.constant 9.99999974E-6 : f32
    %16 = vector.broadcast %cst_8 : f32 to vector<16x1xf32>
    %17 = arith.addf %13, %16 : vector<16x1xf32>
    %18 = math.rsqrt %17 : vector<16x1xf32>
    %19 = vector.broadcast %18 : vector<16x1xf32> to vector<16x32xf32>
    %20 = arith.mulf %15, %19 : vector<16x32xf32>
    %21 = vector.broadcast %1 : vector<1x32xf32> to vector<16x32xf32>
    %22 = arith.mulf %20, %21 : vector<16x32xf32>
    %23 = vector.broadcast %2 : vector<1x32xf32> to vector<16x32xf32>
    %24 = arith.addf %22, %23 : vector<16x32xf32>
    %25 = arith.truncf %24 : vector<16x32xf32> to vector<16x32xbf16>
    %c0_9 = arith.constant 0 : index
    %c0_10 = arith.constant 0 : index
    %26 = vector.load %arg3[%c0_9, %c0_10] : memref<32x96xbf16, #tpu.memory_space<vmem>>, vector<32x96xbf16>
    %cst_11 = arith.constant dense<0.000000e+00> : vector<16x96xf32>
    %27 = tpu.matmul %25, %26, %cst_11 {dimension_numbers = #tpu.dot_dimension_numbers<[1], [0], [0], [1], [0, 0, 1, 1], [], []>} : vector<16x32xbf16>, vector<32x96xbf16>, vector<16x96xf32> -> vector<16x96xf32>
    %28 = vector.extract_strided_slice %27 {offsets = [0, 0], sizes = [16, 32], strides = [1, 1]} : vector<16x96xf32> to vector<16x32xf32>
    %29 = vector.extract_strided_slice %27 {offsets = [0, 32], sizes = [16, 32], strides = [1, 1]} : vector<16x96xf32> to vector<16x32xf32>
    %30 = vector.extract_strided_slice %27 {offsets = [0, 64], sizes = [16, 32], strides = [1, 1]} : vector<16x96xf32> to vector<16x32xf32>
    %c0_12 = arith.constant 0 : index
    %c0_13 = arith.constant 0 : index
    %31 = vector.load %arg8[%c0_12, %c0_13] : memref<64x32xf32, #tpu.memory_space<vmem>>, vector<64x32xf32>
    %32 = tpu.concatenate %28, %28, %28, %28 in 0 : vector<16x32xf32>, vector<16x32xf32>, vector<16x32xf32>, vector<16x32xf32> -> vector<64x32xf32>
    %33 = arith.mulf %32, %31 : vector<64x32xf32>
    %34 = arith.truncf %33 : vector<64x32xf32> to vector<64x32xbf16>
    %35 = arith.truncf %29 : vector<16x32xf32> to vector<16x32xbf16>
    %cst_14 = arith.constant dense<0.000000e+00> : vector<64x16xf32>
    %36 = tpu.matmul %34, %35, %cst_14 {dimension_numbers = #tpu.dot_dimension_numbers<[1], [1], [0], [0], [0, 0, 1, 0], [], []>} : vector<64x32xbf16>, vector<16x32xbf16>, vector<64x16xf32> -> vector<64x16xf32>
    %c0_15 = arith.constant 0 : index
    %c0_16 = arith.constant 0 : index
    %37 = vector.load %arg9[%c0_15, %c0_16] : memref<64x16xf32, #tpu.memory_space<vmem>>, vector<64x16xf32>
    %38 = arith.addf %36, %37 : vector<64x16xf32>
    %cst_17 = arith.constant dense<0xFF800000> : vector<64xf32>
    %39 = vector.multi_reduction <maximumf>, %38, %cst_17 [1] : vector<64x16xf32> to vector<64xf32>
    %40 = vector.shape_cast %39 : vector<64xf32> to vector<64x1xf32>
    %41 = vector.broadcast %40 : vector<64x1xf32> to vector<64x16xf32>
    %42 = arith.subf %38, %41 : vector<64x16xf32>
    %43 = math.exp %42 : vector<64x16xf32>
    %cst_18 = arith.constant dense<0.000000e+00> : vector<64xf32>
    %44 = vector.multi_reduction <add>, %43, %cst_18 [1] : vector<64x16xf32> to vector<64xf32>
    %45 = vector.shape_cast %44 : vector<64xf32> to vector<64x1xf32>
    %46 = tpu.reciprocal %45 {approx = true} : vector<64x1xf32> -> vector<64x1xf32>
    %47 = vector.broadcast %46 : vector<64x1xf32> to vector<64x16xf32>
    %48 = arith.mulf %43, %47 : vector<64x16xf32>
    %49 = arith.truncf %48 : vector<64x16xf32> to vector<64x16xbf16>
    %50 = arith.truncf %30 : vector<16x32xf32> to vector<16x32xbf16>
    %cst_19 = arith.constant dense<0.000000e+00> : vector<64x32xf32>
    %51 = tpu.matmul %49, %50, %cst_19 {dimension_numbers = #tpu.dot_dimension_numbers<[1], [0], [0], [1], [0, 0, 1, 1], [], []>} : vector<64x16xbf16>, vector<16x32xbf16>, vector<64x32xf32> -> vector<64x32xf32>
    %52 = arith.mulf %51, %31 : vector<64x32xf32>
    %53 = vector.extract_strided_slice %52 {offsets = [0, 0], sizes = [16, 32], strides = [1, 1]} : vector<64x32xf32> to vector<16x32xf32>
    %54 = vector.extract_strided_slice %52 {offsets = [16, 0], sizes = [16, 32], strides = [1, 1]} : vector<64x32xf32> to vector<16x32xf32>
    %55 = arith.addf %53, %54 : vector<16x32xf32>
    %56 = vector.extract_strided_slice %52 {offsets = [32, 0], sizes = [16, 32], strides = [1, 1]} : vector<64x32xf32> to vector<16x32xf32>
    %57 = arith.addf %55, %56 : vector<16x32xf32>
    %58 = vector.extract_strided_slice %52 {offsets = [48, 0], sizes = [16, 32], strides = [1, 1]} : vector<64x32xf32> to vector<16x32xf32>
    %59 = arith.addf %57, %58 : vector<16x32xf32>
    %60 = arith.truncf %59 : vector<16x32xf32> to vector<16x32xbf16>
    %c0_20 = arith.constant 0 : index
    %c0_21 = arith.constant 0 : index
    %61 = vector.load %arg4[%c0_20, %c0_21] : memref<32x32xbf16, #tpu.memory_space<vmem>>, vector<32x32xbf16>
    %cst_22 = arith.constant dense<0.000000e+00> : vector<16x32xf32>
    %62 = tpu.matmul %60, %61, %cst_22 {dimension_numbers = #tpu.dot_dimension_numbers<[1], [0], [0], [1], [0, 0, 1, 1], [], []>} : vector<16x32xbf16>, vector<32x32xbf16>, vector<16x32xf32> -> vector<16x32xf32>
    %c0_23 = arith.constant 0 : index
    %c0_24 = arith.constant 0 : index
    %63 = vector.load %arg5[%c0_23, %c0_24] : memref<1x32xf32, #tpu.memory_space<vmem>>, vector<1x32xf32>
    %64 = vector.broadcast %63 : vector<1x32xf32> to vector<16x32xf32>
    %65 = arith.addf %62, %64 : vector<16x32xf32>
    %66 = arith.addf %0, %65 : vector<16x32xf32>
    %c0_25 = arith.constant 0 : index
    %c0_26 = arith.constant 0 : index
    %67 = vector.load %arg6[%c0_25, %c0_26] : memref<1x32xf32, #tpu.memory_space<vmem>>, vector<1x32xf32>
    %c0_27 = arith.constant 0 : index
    %c0_28 = arith.constant 0 : index
    %68 = vector.load %arg7[%c0_27, %c0_28] : memref<1x32xf32, #tpu.memory_space<vmem>>, vector<1x32xf32>
    %cst_29 = arith.constant dense<0.000000e+00> : vector<16xf32>
    %69 = vector.multi_reduction <add>, %66, %cst_29 [1] : vector<16x32xf32> to vector<16xf32>
    %70 = vector.shape_cast %69 : vector<16xf32> to vector<16x1xf32>
    %cst_30 = arith.constant 3.200000e+01 : f32
    %71 = vector.broadcast %cst_30 : f32 to vector<16x1xf32>
    %72 = arith.divf %70, %71 : vector<16x1xf32>
    %73 = arith.mulf %66, %66 : vector<16x32xf32>
    %cst_31 = arith.constant dense<0.000000e+00> : vector<16xf32>
    %74 = vector.multi_reduction <add>, %73, %cst_31 [1] : vector<16x32xf32> to vector<16xf32>
    %75 = vector.shape_cast %74 : vector<16xf32> to vector<16x1xf32>
    %cst_32 = arith.constant 3.200000e+01 : f32
    %76 = vector.broadcast %cst_32 : f32 to vector<16x1xf32>
    %77 = arith.divf %75, %76 : vector<16x1xf32>
    %78 = arith.mulf %72, %72 : vector<16x1xf32>
    %79 = arith.subf %77, %78 : vector<16x1xf32>
    %80 = vector.broadcast %72 : vector<16x1xf32> to vector<16x32xf32>
    %81 = arith.subf %66, %80 : vector<16x32xf32>
    %cst_33 = arith.constant 9.99999974E-6 : f32
    %82 = vector.broadcast %cst_33 : f32 to vector<16x1xf32>
    %83 = arith.addf %79, %82 : vector<16x1xf32>
    %84 = math.rsqrt %83 : vector<16x1xf32>
    %85 = vector.broadcast %84 : vector<16x1xf32> to vector<16x32xf32>
    %86 = arith.mulf %81, %85 : vector<16x32xf32>
    %87 = vector.broadcast %67 : vector<1x32xf32> to vector<16x32xf32>
    %88 = arith.mulf %86, %87 : vector<16x32xf32>
    %89 = vector.broadcast %68 : vector<1x32xf32> to vector<16x32xf32>
    %90 = arith.addf %88, %89 : vector<16x32xf32>
    %c0_34 = arith.constant 0 : index
    %c0_35 = arith.constant 0 : index
    %91 = vector.load %arg12[%c0_34, %c0_35] : memref<1x32xf32, #tpu.memory_space<vmem>>, vector<1x32xf32>
    %92 = vector.broadcast %91 : vector<1x32xf32> to vector<16x32xf32>
    %93 = arith.mulf %90, %92 : vector<16x32xf32>
    %94 = arith.mulf %93, %93 : vector<16x32xf32>
    %cst_36 = arith.constant dense<0.000000e+00> : vector<16xf32>
    %95 = vector.multi_reduction <add>, %94, %cst_36 [1] : vector<16x32xf32> to vector<16xf32>
    %96 = vector.shape_cast %95 : vector<16xf32> to vector<16x1xf32>
    %97 = arith.truncf %93 : vector<16x32xf32> to vector<16x32xbf16>
    %c0_37 = arith.constant 0 : index
    %c0_38 = arith.constant 0 : index
    %98 = vector.load %arg10[%c0_37, %c0_38] : memref<32x32xbf16, #tpu.memory_space<vmem>>, vector<32x32xbf16>
    %cst_39 = arith.constant dense<0.000000e+00> : vector<16x32xf32>
    %99 = tpu.matmul %97, %98, %cst_39 {dimension_numbers = #tpu.dot_dimension_numbers<[1], [1], [0], [0], [0, 0, 1, 0], [], []>} : vector<16x32xbf16>, vector<32x32xbf16>, vector<16x32xf32> -> vector<16x32xf32>
    %c0_40 = arith.constant 0 : index
    %c0_41 = arith.constant 0 : index
    %100 = vector.load %arg11[%c0_40, %c0_41] : memref<1x32xf32, #tpu.memory_space<vmem>>, vector<1x32xf32>
    %101 = vector.broadcast %96 : vector<16x1xf32> to vector<16x32xf32>
    %102 = vector.broadcast %100 : vector<1x32xf32> to vector<16x32xf32>
    %103 = arith.addf %101, %102 : vector<16x32xf32>
    %cst_42 = arith.constant 2.000000e+00 : f32
    %104 = vector.broadcast %cst_42 : f32 to vector<16x32xf32>
    %105 = arith.mulf %104, %99 : vector<16x32xf32>
    %106 = arith.subf %103, %105 : vector<16x32xf32>
    %cst_43 = arith.constant 0.000000e+00 : f32
    %107 = vector.broadcast %cst_43 : f32 to vector<16x32xf32>
    %108 = arith.maximumf %106, %107 : vector<16x32xf32>
    %cst_44 = arith.constant 0.000000e+00 : f32
    %109 = vector.broadcast %cst_44 : f32 to vector<16x32xf32>
    %110 = arith.subf %109, %108 : vector<16x32xf32>
    %111 = math.exp %110 : vector<16x32xf32>
    %112 = arith.truncf %111 : vector<16x32xf32> to vector<16x32xbf16>
    %c0_45 = arith.constant 0 : index
    %c0_46 = arith.constant 0 : index
    %113 = vector.load %arg13[%c0_45, %c0_46] : memref<32x32xbf16, #tpu.memory_space<vmem>>, vector<32x32xbf16>
    %cst_47 = arith.constant dense<0.000000e+00> : vector<16x32xf32>
    %114 = tpu.matmul %112, %113, %cst_47 {dimension_numbers = #tpu.dot_dimension_numbers<[1], [0], [0], [1], [0, 0, 1, 1], [], []>} : vector<16x32xbf16>, vector<32x32xbf16>, vector<16x32xf32> -> vector<16x32xf32>
    %c0_48 = arith.constant 0 : index
    %c0_49 = arith.constant 0 : index
    %115 = vector.load %arg14[%c0_48, %c0_49] : memref<1x32xf32, #tpu.memory_space<vmem>>, vector<1x32xf32>
    %116 = vector.broadcast %115 : vector<1x32xf32> to vector<16x32xf32>
    %117 = arith.addf %114, %116 : vector<16x32xf32>
    %118 = arith.addf %66, %117 : vector<16x32xf32>
    %c0_50 = arith.constant 0 : index
    %c0_51 = arith.constant 0 : index
    %119 = vector.load %arg15[%c0_50, %c0_51] : memref<16x32xf32, #tpu.memory_space<vmem>>, vector<16x32xf32>
    tpu.vector_store %arg15[%c0_50, %c0_51], %118 {strides = array<i32>} : memref<16x32xf32, #tpu.memory_space<vmem>>, vector<16x32xf32>,
    return
  }
}

</mosaic_0001>

<bundles_post_ra>
// kernel: tpu_custom_call.1
= control target key start
LH: loop header
LB: loop body
LE: loop exit
PB: predicated region body
PF: predicated region fallthrough
CT: control target
= control target key end

     0   :  { %vm56_vm0 = vcmask 261120   ;;  %s1277_s0 = inlined_call_operand.vmem [shape: f32[16,32], index: 0, kind: input, shape index: {}]   ;;  %s1278_s1 = inlined_call_operand.vmem [shape: f32[1,32], index: 1, kind: input, shape index: {}]   ;;  %s1279_s2 = inlined_call_operand.vmem [shape: f32[1,32], index: 2, kind: input, shape index: {}]   ;;  %s1280_s3 = inlined_call_operand.vmem [shape: bf16[32,96], index: 3, kind: input, shape index: {}]   ;;  %s1281_s4 = inlined_call_operand.vmem [shape: bf16[32,32], index: 4, kind: input, shape index: {}]   ;;  %s1282_s5 = inlined_call_operand.vmem [shape: f32[1,32], index: 5, kind: input, shape index: {}]   ;;  %s1283_s6 = inlined_call_operand.vmem [shape: f32[1,32], index: 6, kind: input, shape index: {}]   ;;  %s1284_s7 = inlined_call_operand.vmem [shape: f32[1,32], index: 7, kind: input, shape index: {}]   ;;  %s1285_s8 = inlined_call_operand.vmem [shape: f32[64,32], index: 8, kind: input, shape index: {}]   ;;  %s1286_s9 = inlined_call_operand.vmem [shape: f32[64,16], index: 9, kind: input, shape index: {}]   ;;  %s1287_s10 = inlined_call_operand.vmem [shape: bf16[32,32], index: 10, kind: input, shape index: {}]   ;;  %s1288_s11 = inlined_call_operand.vmem [shape: f32[1,32], index: 11, kind: input, shape index: {}]   ;;  %s1289_s12 = inlined_call_operand.vmem [shape: f32[1,32], index: 12, kind: input, shape index: {}]   ;;  %s1290_s13 = inlined_call_operand.vmem [shape: bf16[32,32], index: 13, kind: input, shape index: {}]   ;;  %s1291_s14 = inlined_call_operand.vmem [shape: f32[1,32], index: 14, kind: input, shape index: {}]   ;;  %s1292_s15 = inlined_call_operand.hbm [shape: f32[16,32], index: 15, kind: output, shape index: {}]  }
   0x1   :  { %v1047_v0 = vld [vmem:[%s1277_s0] sm:$0xff]  ;;  %v1052_v1 = vld [vmem:[%s1277_s0 + $0x8] sm:$0xff] }
   0x2   :  { %v57_v2 = vsel %vm56_vm0, %v1047_v0, 0.0  ;;  %v66_v3 = vmul.f32 %v1047_v0, %v1047_v0  ;;  %v60_v4 = vsel %vm56_vm0, %v1052_v1, 0.0  ;;  %v67_v5 = vmul.f32 %v1052_v1, %v1052_v1 }
   0x3   :  { %58 = vadd.xlane.f32.xlu0 %v57_v2 }
   0x4   :  { %v68_v6 = vsel %vm56_vm0, %v66_v3, 0.0  ;;  %v71_v7 = vsel %vm56_vm0, %v67_v5, 0.0 }
   0x5   :  { %69 = vadd.xlane.f32.xlu1 %v68_v6 }
   0x7   :  { %61 = vadd.xlane.f32.xlu0 %v60_v4 }
   0x8   :  { %20 = vsyncpa [#allocation3], 0  ;;  %v883_v8 = vld [vmem:[%s1280_s3 + $0x8] sm:$0xff]   ;;  %v957_v9 = vmov 0.0   ;;  %vm958_vm1 = vmmov 0   ;;  %v884_v10 = vld [vmem:[%s1280_s3] sm:$0xff]  }
   0x9   :  { %72 = vadd.xlane.f32.xlu1 %v71_v7  ;;  %823 = vmatprep.subr.bf16.mxu0 %v957_v9  ;;  %v773_v28 = vld [vmem:[%s1278_s1] ss:$0 sm:$0xff]  ;;  %v1086_v39 = vld [vmem:[%s1285_s8 + $0x10] sm:$0xff]  ;;  %v1101_v43 = vld [vmem:[%s1285_s8 + $0x18] sm:$0xff]  ;;  %vm277_vm2 = vcmask 130048   ;;  %s961_s20 = smov [#allocation2]  }
   0xa   :  { %827 = vmatprep.mubr.msk.bf16.mxu0 %vm958_vm1, %v957_v9  ;;  %824 = vmatpush3.bf16.msra.mxu0 %v883_v8  ;;  %v774_v33 = vld [vmem:[%s1279_s2] ss:$0 sm:$0xff]  ;;  %v1096_v41 = vld [vmem:[%s1285_s8 + $0x30] sm:$0xff]  ;;  %v1106_v44 = vld [vmem:[%s1285_s8 + $0x28] sm:$0xff]  ;;  %s762_s21 = sshll.u32 %s961_s20, 4  ;;  %s763_s21 = int_to_ptr.vmem [resolvable:$true] %s762_s21 }
   0xb   :  { %825 = vmatprep.subr.bf16.mxu0 %v957_v9  ;;  %v1091_v40 = vld [vmem:[%s1285_s8 + $0x20] sm:$0xff]  ;;  %v1111_v45 = vld [vmem:[%s1285_s8 + $0x38] sm:$0xff]  ;;  %v1121_v47 = vld [vmem:[%s1285_s8 + $0x8] sm:$0xff]  ;;  %s935_s0 = scalar_lea.vmem %s763_s21, 256  ;;  %p940_p1 = scmp.lt.s32.totalorder %s763_s21, %s763_s21 }
   0xc   :  { %v1116_v46 = vld [vmem:[%s1285_s8] sm:$0xff]  ;;  %s959_s8 = smov 96   ;;  %v188_v3 = vld [vmem:[%s1286_s9 + $0x10] sm:$0xff]  ;;  %p936_p0 = scmp.ne.s32.totalorder %s763_s21, %s935_s0 }
   0xd   :  { %v186_v5 = vld [vmem:[%s1286_s9] sm:$0xff]  ;;  %p941_p2 = scmp.lt.s32.totalorder %s935_s0, %s935_s0 }
   0xe   :  { %826 = vmatpush3.bf16.msra.mxu0 %v884_v10 }
   0xf   :  { %p942_p3 = por %p941_p2, %p940_p1 }
  0x11   :  { %p943_p4 = pnand %p942_p3, %p936_p0 }
  0x8c   :  { %v59_v11 = vpop.xlane.xlu0 %58 }
  0x8d   :  { %v64_v12 = vmul.f32 0.03125, %v59_v11  ;;  %v189_v11 = vld [vmem:[%s1286_s9 + $0x18] sm:$0xff] }
  0x8e   :  { %v70_v13 = vpop.xlane.xlu1 %69 }
  0x8f   :  { %v76_v14 = vmul.f32 %v64_v12, %v64_v12  ;;  %v74_v15 = vmul.f32 0.03125, %v70_v13  ;;  %v80_v25 = vsub.f32 %v1047_v0, %v64_v12 }
  0x90   :  { %v62_v16 = vpop.xlane.xlu0 %61 }
  0x91   :  { %v78_v17 = vsub.f32 %v74_v15, %v76_v14  ;;  %v65_v18 = vmul.f32 0.03125, %v62_v16  ;;  %v192_v14 = vld [vmem:[%s1286_s9 + $0x30] sm:$0xff] }
  0x92   :  { %v73_v19 = vpop.xlane.xlu1 %72 }
  0x93   :  { %v82_v20 = vadd.f32 1e-05, %v78_v17  ;;  %v77_v21 = vmul.f32 %v65_v18, %v65_v18  ;;  %v75_v22 = vmul.f32 0.03125, %v73_v19  ;;  %v81_v29 = vsub.f32 %v1052_v1, %v65_v18  ;;  %v187_v17 = vld [vmem:[%s1286_s9 + $0x8] sm:$0xff] }
  0x95   :  { %891 = vrsqrt.f32 %v82_v20  ;;  %v79_v23 = vsub.f32 %v75_v22, %v77_v21 }
  0x97   :  { %v83_v24 = vadd.f32 1e-05, %v79_v23 }
  0x99   :  { %893 = vrsqrt.f32 %v83_v24  ;;  %v190_v24 = vld [vmem:[%s1286_s9 + $0x20] sm:$0xff] }
  0xa2   :  { %v892_v26 = vpop.eup %891 }
  0xa3   :  { %v86_v27 = vmul.f32 %v892_v26, %v80_v25 }
  0xa5   :  { %v94_v32 = vmul.f32 %v773_v28, %v86_v27 }
  0xa6   :  { %v894_v30 = vpop.eup %893 }
  0xa7   :  { %v87_v31 = vmul.f32 %v894_v30, %v81_v29  ;;  %v102_v35 = vadd.f32 %v774_v33, %v94_v32  ;;  %v191_v29 = vld [vmem:[%s1286_s9 + $0x28] sm:$0xff]  ;;  %v193_v32 = vld [vmem:[%s1286_s9 + $0x38] sm:$0xff]  ;;  %s960_s9 = smov 64  }
  0xa9   :  { %v95_v34 = vmul.f32 %v773_v28, %v87_v31 }
  0xab   :  { %v103_v36 = vadd.f32 %v774_v33, %v95_v34 }
  0xad   :  { %v104_v37 = vpack.c.bf16 %v103_v36, %v102_v35 }
  0xaf   :  { %828 = vmatmul.mubr.msk.bf16.vlgmr.msra.gmra.mxu0 %vm56_vm0, %v104_v37 }
 0x16f   :  { %v158_v38 = vpop.f32.mrf.mxu0 }
 0x170   :  { %v175_v48 = vmul.f32 %v1086_v39, %v158_v38  ;;  %v177_v49 = vmul.f32 %v1091_v40, %v158_v38  ;;  %v179_v50 = vmul.f32 %v1096_v41, %v158_v38  ;;  %v173_v57 = vmul.f32 %v1116_v46, %v158_v38 }
 0x171   :  { %v829_v42 = vpop.f32.mrf.mxu0 }
 0x173   :  { %v161_v51 = vpop.f32.mrf.mxu0 }
 0x174   :  { %v176_v52 = vmul.f32 %v1101_v43, %v161_v51  ;;  %v178_v53 = vmul.f32 %v1106_v44, %v161_v51  ;;  %v180_v54 = vmul.f32 %v1111_v45, %v161_v51  ;;  %v1129_v55 = vpack.c.bf16 %v161_v51, %v158_v38 }
 0x175   :  { %v830_v56 = vpop.f32.mrf.mxu0  ;;  %v174_v58 = vmul.f32 %v1121_v47, %v161_v51 }
 0x176   :  { %195 = vrot.lane.b32.xlu0 %v1129_v55, %s959_s8  ;;  %v182_v59 = vpack.c.bf16 %v176_v52, %v175_v48  ;;  %v183_v60 = vpack.c.bf16 %v178_v53, %v177_v49  ;;  %v184_v61 = vpack.c.bf16 %v180_v54, %v179_v50 }
 0x177   :  { %v181_v62 = vpack.c.bf16 %v174_v58, %v173_v57 }
 0x179   :  { %833 = vmatprep.mubr.msk.bf16.mxu1 %vm56_vm0, %v181_v62 }
 0x1e8   :  { %v196_v63 = vpop.permute.xlu0 %195 }
 0x1e9   :  { %875 = vmatprep.subr.msk.bf16.mxu1 %vm56_vm0, %v196_v63  ;;  %v210_v2 = vsel %vm56_vm0, %v196_v63, 0 }
 0x1ea   :  { %832 = vmatpush3.bf16.xpose.msra.mxu1 %v210_v2 }
 0x1eb   :  { %851 = vmatprep.subr.bf16.mxu1 %v957_v9 }
 0x1f1   :  { %834 = vmatmul.mubr.msk.bf16.vlgmr.msra.gmra.mxu1 %vm56_vm0, %v182_v59 }
 0x1f2   :  { %837 = vmatprep.mubr.msk.bf16.mxu1 %vm56_vm0, %v183_v60 }
 0x1f9   :  { %838 = vmatmul.mubr.msk.bf16.gmra.mxu1 %vm56_vm0, %v184_v61 }
 0x1fa   :  { %855 = vmatprep.mubr.msk.bf16.mxu1 %vm958_vm1, %v957_v9 }
 0x2b1   :  { %v835_v4 = vpop.f32.mrf.mxu1 }
 0x2b2   :  { %v255_v6 = vadd.f32 %v835_v4, %v188_v3 }
 0x2b3   :  { %v246_v7 = vpop.f32.mrf.mxu1 }
 0x2b4   :  { %v247_v8 = vadd.f32 %v246_v7, %v186_v5  ;;  %v284_v10 = vsel %vm277_vm2, %v255_v6, -inf }
 0x2b5   :  { %285 = vmax.xlane.f32.xlu1 %v284_v10  ;;  %v836_v12 = vpop.f32.mrf.mxu1 }
 0x2b6   :  { %v258_v15 = vadd.f32 %v836_v12, %v189_v11  ;;  %v278_v16 = vsel %vm277_vm2, %v247_v8, -inf }
 0x2b7   :  { %v249_v13 = vpop.f32.mrf.mxu1 }
 0x2b8   :  { %v250_v21 = vadd.f32 %v249_v13, %v187_v17  ;;  %v287_v23 = vsel %vm277_vm2, %v258_v15, -inf }
 0x2b9   :  { %v839_v18 = vpop.f32.mrf.mxu1  ;;  %279 = vmax.xlane.f32.xlu1 %v278_v16 }
 0x2ba   :  { %v271_v19 = vadd.f32 %v839_v18, %v192_v14  ;;  %v281_v27 = vsel %vm277_vm2, %v250_v21, -inf }
 0x2bb   :  { %v262_v20 = vpop.f32.mrf.mxu1 }
 0x2bc   :  { %v296_v22 = vsel %vm277_vm2, %v271_v19, -inf  ;;  %v263_v26 = vadd.f32 %v262_v20, %v190_v24 }
 0x2bd   :  { %297 = vmax.xlane.f32.xlu0 %v296_v22  ;;  %v840_v25 = vpop.f32.mrf.mxu1  ;;  %288 = vmax.xlane.f32.xlu1 %v287_v23 }
 0x2be   :  { %v290_v31 = vsel %vm277_vm2, %v263_v26, -inf  ;;  %v274_v33 = vadd.f32 %v840_v25, %v193_v32 }
 0x2bf   :  { %v265_v28 = vpop.f32.mrf.mxu1 }
 0x2c0   :  { %v266_v30 = vadd.f32 %v265_v28, %v191_v29  ;;  %v299_v35 = vsel %vm277_vm2, %v274_v33, -inf }
 0x2c1   :  { %282 = vmax.xlane.f32.xlu1 %v281_v27 }
 0x2c2   :  { %v293_v34 = vsel %vm277_vm2, %v266_v30, -inf }
 0x2c5   :  { %291 = vmax.xlane.f32.xlu1 %v290_v31 }
 0x2c9   :  { %294 = vmax.xlane.f32.xlu1 %v293_v34 }
 0x2cd   :  { %300 = vmax.xlane.f32.xlu1 %v299_v35 }
 0x33e   :  { %v286_v36 = vpop.xlane.xlu1 %285 }
 0x33f   :  { %v304_v37 = vsub.f32 %v255_v6, %v286_v36 }
 0x341   :  { %v314_v38 = vmul.f32 1.442695, %v304_v37 }
 0x342   :  { %v280_v42 = vpop.xlane.xlu1 %279 }
 0x343   :  { %895 = vpow2.f32 %v314_v38  ;;  %v302_v48 = vsub.f32 %v247_v8, %v280_v42 }
 0x345   :  { %v310_v49 = vmul.f32 1.442695, %v302_v48 }
 0x346   :  { %v289_v50 = vpop.xlane.xlu1 %288  ;;  %v298_v51 = vpop.xlane.xlu0 %297 }
 0x347   :  { %897 = vpow2.f32 %v310_v49  ;;  %v305_v52 = vsub.f32 %v258_v15, %v289_v50  ;;  %v308_v54 = vsub.f32 %v271_v19, %v298_v51 }
 0x349   :  { %v316_v53 = vmul.f32 1.442695, %v305_v52  ;;  %v322_v59 = vmul.f32 1.442695, %v308_v54 }
 0x34a   :  { %v283_v56 = vpop.xlane.xlu1 %282 }
 0x34b   :  { %v303_v57 = vsub.f32 %v250_v21, %v283_v56  ;;  %899 = vpow2.f32 %v316_v53 }
 0x34d   :  { %v312_v58 = vmul.f32 1.442695, %v303_v57 }
 0x34e   :  { %v292_v60 = vpop.xlane.xlu1 %291 }
 0x34f   :  { %901 = vpow2.f32 %v312_v58  ;;  %v306_v61 = vsub.f32 %v263_v26, %v292_v60 }
 0x350   :  { %v1175_v62 = vpop.eup %895  ;;  %903 = vpow2.f32 %v322_v59 }
 0x351   :  { %v332_v63 = vsel %vm277_vm2, %v1175_v62, 0.0  ;;  %v318_v2 = vmul.f32 1.442695, %v306_v61  ;;  %v885_v61 = vld [vmem:[%s1281_s4 + $0x8] sm:$0xff]  }
 0x352   :  { %333 = vadd.xlane.f32.xlu1 %v332_v63  ;;  %v295_v3 = vpop.xlane.xlu1 %294  ;;  %852 = vmatpush3.bf16.msra.mxu1 %v885_v61 }
 0x353   :  { %v307_v4 = vsub.f32 %v266_v30, %v295_v3  ;;  %905 = vpow2.f32 %v318_v2  ;;  %853 = vmatprep.subr.bf16.mxu1 %v957_v9 }
 0x354   :  { %v898_v5 = vpop.eup %897 }
 0x355   :  { %v326_v6 = vsel %vm277_vm2, %v898_v5, 0.0  ;;  %v320_v7 = vmul.f32 1.442695, %v307_v4 }
 0x356   :  { %327 = vadd.xlane.f32.xlu1 %v326_v6  ;;  %v301_v8 = vpop.xlane.xlu1 %300 }
 0x357   :  { %v309_v10 = vsub.f32 %v274_v33, %v301_v8  ;;  %907 = vpow2.f32 %v320_v7 }
 0x358   :  { %v900_v11 = vpop.eup %899 }
 0x359   :  { %v324_v12 = vmul.f32 1.442695, %v309_v10  ;;  %v335_v13 = vsel %vm277_vm2, %v900_v11, 0.0 }
 0x35a   :  { %336 = vadd.xlane.f32.xlu1 %v335_v13 }
 0x35b   :  { %909 = vpow2.f32 %v324_v12 }
 0x35c   :  { %v902_v14 = vpop.eup %901 }
 0x35d   :  { %v329_v15 = vsel %vm277_vm2, %v902_v14, 0.0  ;;  %v904_v16 = vpop.eup %903 }
 0x35e   :  { %330 = vadd.xlane.f32.xlu1 %v329_v15  ;;  %v344_v17 = vsel %vm277_vm2, %v904_v16, 0.0 }
 0x360   :  { %v906_v18 = vpop.eup %905 }
 0x361   :  { %v338_v19 = vsel %vm277_vm2, %v906_v18, 0.0 }
 0x362   :  { %345 = vadd.xlane.f32.xlu1 %v344_v17 }
 0x364   :  { %v908_v20 = vpop.eup %907 }
 0x365   :  { %v341_v23 = vsel %vm277_vm2, %v908_v20, 0.0 }
 0x366   :  { %339 = vadd.xlane.f32.xlu1 %v338_v19 }
 0x368   :  { %v910_v21 = vpop.eup %909 }
 0x369   :  { %v347_v22 = vsel %vm277_vm2, %v910_v21, 0.0 }
 0x36a   :  { %348 = vadd.xlane.f32.xlu0 %v347_v22  ;;  %342 = vadd.xlane.f32.xlu1 %v341_v23 }
 0x37b   :  { %370 = vrot.lane.b32.xlu1 %v1129_v55, %s960_s9 }
 0x3db   :  { %v334_v24 = vpop.xlane.xlu1 %333 }
 0x3df   :  { %v328_v25 = vpop.xlane.xlu1 %327 }
 0x3e0   :  { %911 = vrcp.f32 %v328_v25 }
 0x3e3   :  { %v337_v26 = vpop.xlane.xlu1 %336 }
 0x3e4   :  { %913 = vrcp.f32 %v337_v26 }
 0x3e5   :  { %915 = vrcp.f32 %v334_v24 }
 0x3e7   :  { %v331_v27 = vpop.xlane.xlu1 %330 }
 0x3e8   :  { %917 = vrcp.f32 %v331_v27 }
 0x3eb   :  { %v346_v28 = vpop.xlane.xlu1 %345 }
 0x3ec   :  { %919 = vrcp.f32 %v346_v28 }
 0x3ed   :  { %v912_v30 = vpop.eup %911 }
 0x3ee   :  { %v358_v35 = vmul.f32 %v912_v30, %v898_v5 }
 0x3ef   :  { %v340_v29 = vpop.xlane.xlu1 %339 }
 0x3f0   :  { %921 = vrcp.f32 %v340_v29 }
 0x3f1   :  { %v914_v32 = vpop.eup %913 }
 0x3f2   :  { %v916_v34 = vpop.eup %915  ;;  %v361_v37 = vmul.f32 %v914_v32, %v900_v11  ;;  %v888_v32 = vld [vmem:[%s1287_s10] sm:$0xff]  }
 0x3f3   :  { %v349_v31 = vpop.xlane.xlu0 %348  ;;  %v343_v33 = vpop.xlane.xlu1 %342  ;;  %v360_v48 = vmul.f32 %v916_v34, %v1175_v62  ;;  %v886_v62 = vld [vmem:[%s1281_s4] sm:$0xff]  }
 0x3f4   :  { %923 = vrcp.f32 %v349_v31  ;;  %854 = vmatpush3.bf16.msra.mxu1 %v886_v62  ;;  %v887_v31 = vld [vmem:[%s1287_s10 + $0x8] sm:$0xff]   ;;  %v792_v62 = vld [vmem:[%s1289_s12] ss:$0 sm:$0xff] }
 0x3f5   :  { %925 = vrcp.f32 %v343_v33  ;;  %v918_v55 = vpop.eup %917  ;;  %v367_v49 = vpack.c.bf16 %v361_v37, %v360_v48  ;;  %867 = vmatprep.subr.bf16.mxu1 %v957_v9  ;;  %v618_v33 = vsel %vm56_vm0, %v888_v32, 0 }
 0x3f6   :  { %v359_v36 = vmul.f32 %v918_v55, %v902_v14 }
 0x3f7   :  { %v371_v38 = vpop.permute.xlu1 %370 }
 0x3f8   :  { %841 = vmatprep.subr.bf16.mxu0 %v371_v38  ;;  %v366_v42 = vpack.c.bf16 %v359_v36, %v358_v35 }
 0x3f9   :  { %842 = vmatpush3.bf16.msra.mxu0 %v371_v38  ;;  %v920_v50 = vpop.eup %919 }
 0x3fa   :  { %843 = vmatprep.mubr.msk.bf16.mxu0 %vm277_vm2, %v366_v42  ;;  %859 = vmatprep.subr.bf16.mxu0 %v957_v9  ;;  %v364_v54 = vmul.f32 %v920_v50, %v904_v16 }
 0x3fc   :  { %844 = vmatmul.mubr.msk.bf16.vlgmr.msra.gmra.mxu0 %vm277_vm2, %v367_v49 }
 0x3fd   :  { %v922_v51 = vpop.eup %921 }
 0x3fe   :  { %v362_v57 = vmul.f32 %v922_v51, %v906_v18 }
 0x401   :  { %v924_v52 = vpop.eup %923 }
 0x402   :  { %v926_v53 = vpop.eup %925  ;;  %v365_v56 = vmul.f32 %v924_v52, %v910_v21 }
 0x403   :  { %v363_v58 = vmul.f32 %v926_v53, %v908_v20 }
 0x404   :  { %v369_v59 = vpack.c.bf16 %v365_v56, %v364_v54 }
 0x405   :  { %v368_v60 = vpack.c.bf16 %v363_v58, %v362_v57  ;;  %v790_v58 = vld [vmem:[%s1283_s6] ss:$0 sm:$0xff] }
 0x407   :  { %847 = vmatprep.mubr.msk.bf16.mxu0 %vm277_vm2, %v368_v60  ;;  %v791_v60 = vld [vmem:[%s1284_s7] ss:$0 sm:$0xff] }
 0x408   :  { %848 = vmatmul.mubr.msk.bf16.gmra.mxu0 %vm277_vm2, %v369_v59 }
 0x409   :  { %863 = vmatprep.mubr.msk.bf16.mxu0 %vm958_vm1, %v957_v9 }
 0x4bc   :  { %v845_v63 = vpop.f32.mrf.mxu0 }
 0x4bd   :  { %v452_v8 = vmul.f32 %v845_v63, %v1086_v39 }
 0x4be   :  { %v419_v2 = vpop.f32.mrf.mxu0 }
 0x4bf   :  { %v450_v6 = vmul.f32 %v419_v2, %v1116_v46 }
 0x4c0   :  { %v846_v3 = vpop.f32.mrf.mxu0 }
 0x4c1   :  { %v458_v13 = vadd.f32 %v452_v8, %v450_v6  ;;  %v453_v14 = vmul.f32 %v846_v3, %v1101_v43 }
 0x4c2   :  { %v422_v4 = vpop.f32.mrf.mxu0 }
 0x4c3   :  { %v451_v10 = vmul.f32 %v422_v4, %v1121_v47 }
 0x4c5   :  { %v459_v16 = vadd.f32 %v453_v14, %v451_v10 }
 0x4c8   :  { %v849_v5 = vpop.f32.mrf.mxu0 }
 0x4c9   :  { %v456_v19 = vmul.f32 %v849_v5, %v1096_v41 }
 0x4ca   :  { %v435_v7 = vpop.f32.mrf.mxu0 }
 0x4cb   :  { %v454_v11 = vmul.f32 %v435_v7, %v1091_v40  ;;  %v786_v40 = vld [vmem:[%s1282_s5] ss:$0 sm:$0xff] }
 0x4cc   :  { %v850_v12 = vpop.f32.mrf.mxu0 }
 0x4cd   :  { %v460_v17 = vadd.f32 %v458_v13, %v454_v11  ;;  %v457_v46 = vmul.f32 %v850_v12, %v1111_v45 }
 0x4ce   :  { %v438_v15 = vpop.f32.mrf.mxu0 }
 0x4cf   :  { %v455_v18 = vmul.f32 %v438_v15, %v1106_v44  ;;  %v462_v21 = vadd.f32 %v460_v17, %v456_v19  ;;  %v889_v15 = vld [vmem:[%s1290_s13 + $0x8] sm:$0xff]   ;;  %v796_v17 = vld [vmem:[%s1288_s11] ss:$0 sm:$0xff] }
 0x4d1   :  { %v461_v20 = vadd.f32 %v459_v16, %v455_v18  ;;  %v890_v16 = vld [vmem:[%s1290_s13] sm:$0xff]  }
 0x4d3   :  { %v463_v39 = vadd.f32 %v461_v20, %v457_v46 }
 0x4d5   :  { %v464_v22 = vpack.c.bf16 %v463_v39, %v462_v21 }
 0x4d7   :  { %856 = vmatmul.mubr.msk.bf16.vlgmr.msra.gmra.mxu1 %vm56_vm0, %v464_v22 }
 0x4d8   :  { %871 = vmatprep.mubr.msk.bf16.mxu1 %vm958_vm1, %v957_v9  ;;  %868 = vmatpush3.bf16.msra.mxu1 %v889_v15 }
 0x4d9   :  { %869 = vmatprep.subr.bf16.mxu1 %v957_v9 }
 0x4dc   :  { %870 = vmatpush3.bf16.msra.mxu1 %v890_v16 }
 0x597   :  { %v525_v43 = vpop.f32.mrf.mxu1 }
 0x598   :  { %v526_v47 = vadd.f32 %v786_v40, %v525_v43 }
 0x599   :  { %v857_v44 = vpop.f32.mrf.mxu1 }
 0x59a   :  { %v1218_v41 = vadd.f32 %v526_v47, %v1047_v0 }
 0x59b   :  { %v528_v45 = vpop.f32.mrf.mxu1 }
 0x59c   :  { %v529_v23 = vadd.f32 %v786_v40, %v528_v45  ;;  %v536_v24 = vsel %vm56_vm0, %v1218_v41, 0.0  ;;  %v544_v25 = vmul.f32 %v1218_v41, %v1218_v41 }
 0x59d   :  { %537 = vadd.xlane.f32.xlu0 %v536_v24  ;;  %v858_v26 = vpop.f32.mrf.mxu1 }
 0x59e   :  { %v1225_v27 = vadd.f32 %v529_v23, %v1052_v1  ;;  %v546_v28 = vsel %vm56_vm0, %v544_v25, 0.0  ;;  %v621_v1 = vsel %vm56_vm0, %v887_v31, 0  ;;  %v797_v31 = vld [vmem:[%s1291_s14] ss:$0 sm:$0xff] }
 0x59f   :  { %860 = vmatpush3.bf16.xpose.msra.mxu0 %v621_v1 }
 0x5a0   :  { %v539_v0 = vsel %vm56_vm0, %v1225_v27, 0.0  ;;  %v545_v29 = vmul.f32 %v1225_v27, %v1225_v27  ;;  %861 = vmatprep.subr.bf16.mxu0 %v957_v9 }
 0x5a1   :  { %547 = vadd.xlane.f32.xlu0 %v546_v28 }
 0x5a2   :  { %v549_v30 = vsel %vm56_vm0, %v545_v29, 0.0 }
 0x5a5   :  { %540 = vadd.xlane.f32.xlu0 %v539_v0 }
 0x5a7   :  { %862 = vmatpush3.bf16.xpose.msra.mxu0 %v618_v33 }
 0x5a9   :  { %550 = vadd.xlane.f32.xlu0 %v549_v30 }
 0x626   :  { %v538_v34 = vpop.xlane.xlu0 %537 }
 0x627   :  { %v542_v55 = vmul.f32 0.03125, %v538_v34 }
 0x629   :  { %v554_v36 = vmul.f32 %v542_v55, %v542_v55  ;;  %v558_v56 = vsub.f32 %v1218_v41, %v542_v55 }
 0x62a   :  { %v548_v35 = vpop.xlane.xlu0 %547 }
 0x62b   :  { %v552_v37 = vmul.f32 0.03125, %v548_v35 }
 0x62d   :  { %v556_v38 = vsub.f32 %v552_v37, %v554_v36 }
 0x62e   :  { %v541_v42 = vpop.xlane.xlu0 %540 }
 0x62f   :  { %v560_v48 = vadd.f32 1e-05, %v556_v38  ;;  %v543_v49 = vmul.f32 0.03125, %v541_v42 }
 0x631   :  { %927 = vrsqrt.f32 %v560_v48  ;;  %v555_v51 = vmul.f32 %v543_v49, %v543_v49  ;;  %v559_v2 = vsub.f32 %v1225_v27, %v543_v49 }
 0x632   :  { %v551_v50 = vpop.xlane.xlu0 %550 }
 0x633   :  { %v553_v52 = vmul.f32 0.03125, %v551_v50 }
 0x635   :  { %v557_v53 = vsub.f32 %v553_v52, %v555_v51 }
 0x637   :  { %v561_v54 = vadd.f32 1e-05, %v557_v53 }
 0x639   :  { %929 = vrsqrt.f32 %v561_v54 }
 0x63e   :  { %v928_v57 = vpop.eup %927 }
 0x63f   :  { %v564_v59 = vmul.f32 %v928_v57, %v558_v56 }
 0x641   :  { %v572_v61 = vmul.f32 %v790_v58, %v564_v59 }
 0x643   :  { %v580_v63 = vadd.f32 %v791_v60, %v572_v61 }
 0x645   :  { %v589_v3 = vmul.f32 %v792_v62, %v580_v63 }
 0x646   :  { %v930_v4 = vpop.eup %929 }
 0x647   :  { %v591_v5 = vmul.f32 %v589_v3, %v589_v3  ;;  %v565_v6 = vmul.f32 %v930_v4, %v559_v2 }
 0x649   :  { %v593_v7 = vsel %vm56_vm0, %v591_v5, 0.0  ;;  %v573_v8 = vmul.f32 %v790_v58, %v565_v6 }
 0x64a   :  { %594 = vadd.xlane.f32.xlu0 %v593_v7 }
 0x64b   :  { %v581_v10 = vadd.f32 %v791_v60, %v573_v8 }
 0x64d   :  { %v590_v11 = vmul.f32 %v792_v62, %v581_v10 }
 0x64f   :  { %v599_v12 = vpack.c.bf16 %v590_v11, %v589_v3  ;;  %v592_v13 = vmul.f32 %v590_v11, %v590_v11 }
 0x651   :  { %864 = vmatmul.mubr.msk.bf16.vlgmr.msra.gmra.mxu0 %vm56_vm0, %v599_v12  ;;  %v596_v14 = vsel %vm56_vm0, %v592_v13, 0.0 }
 0x652   :  { %597 = vadd.xlane.f32.xlu1 %v596_v14 }
 0x6d3   :  { %v595_v18 = vpop.xlane.xlu0 %594 }
 0x6d4   :  { %v671_v46 = vadd.f32 %v796_v17, %v595_v18 }
 0x6db   :  { %v598_v21 = vpop.xlane.xlu1 %597 }
 0x6dc   :  { %v672_v43 = vadd.f32 %v796_v17, %v598_v21 }
 0x711   :  { %v657_v19 = vpop.f32.mrf.mxu0 }
 0x712   :  { %v673_v20 = vmul.f32 2.0, %v657_v19 }
 0x713   :  { %v865_v39 = vpop.f32.mrf.mxu0 }
 0x714   :  { %v675_v22 = vsub.f32 %v671_v46, %v673_v20 }
 0x715   :  { %v660_v40 = vpop.f32.mrf.mxu0 }
 0x716   :  { %v677_v47 = vmax.f32 %v675_v22, 0.0  ;;  %v674_v44 = vmul.f32 2.0, %v660_v40 }
 0x717   :  { %v866_v45 = vpop.f32.mrf.mxu0 }
 0x718   :  { %v679_v23 = vsub.f32 0.0, %v677_v47  ;;  %v676_v24 = vsub.f32 %v672_v43, %v674_v44 }
 0x71a   :  { %v678_v9 = vmax.f32 %v676_v24, 0.0  ;;  %v681_v25 = vmul.f32 1.442695, %v679_v23 }
 0x71c   :  { %v680_v26 = vsub.f32 0.0, %v678_v9  ;;  %931 = vpow2.f32 %v681_v25 }
 0x71e   :  { %v683_v28 = vmul.f32 1.442695, %v680_v26 }
 0x720   :  { %933 = vpow2.f32 %v683_v28 }
 0x729   :  { %v932_v0 = vpop.eup %931 }
 0x72d   :  { %v934_v29 = vpop.eup %933 }
 0x72e   :  { %v685_v30 = vpack.c.bf16 %v934_v29, %v932_v0 }
 0x730   :  { %872 = vmatmul.mubr.msk.bf16.vlgmr.msra.gmra.mxu1 %vm56_vm0, %v685_v30 }
 0x7f0   :  { %v746_v1 = vpop.f32.mrf.mxu1 }
 0x7f1   :  { %v747_v32 = vadd.f32 %v797_v31, %v746_v1 }
 0x7f2   :  { %v873_v33 = vpop.f32.mrf.mxu1 }
 0x7f3   :  { %v753_v34 = vadd.f32 %v747_v32, %v1218_v41 }
 0x7f4   :  { %v749_v55 = vpop.f32.mrf.mxu1 }
 0x7f5   :  { %755 = vst.msk [vmem:[#allocation2] sm:$0xff] %vm56_vm0, %v753_v34  ;;  %v750_v35 = vadd.f32 %v797_v31, %v749_v55 }
 0x7f6   :  { %v874_v36 = vpop.f32.mrf.mxu1 }
 0x7f7   :  { %v754_v37 = vadd.f32 %v750_v35, %v1225_v27 }
 0x7f9   :  { %756 = vst.msk [vmem:[#allocation2 + $0x8] sm:$0xff] %vm56_vm0, %v754_v37 }
 0x7fa   :  { %946 = shalt.err (!%p943_p4)
}
 0x7fb   :  { %s962_s14 = smov 128   ;;  %s963_s22 = smov 8  }
 0x7fc   :  { %768 = dma.vmem_to_hbm [thread:$0]  %s763_s21, 256, %s1292_s15, [#allocation3], %s962_s14, %s962_s14, %s963_s22  }
 0x7fd   :  { %955 = dma.done.wait [#allocation3], 256  }
 0x7fe   :  { %956 = vsyncadd [#allocation3], 4294967040 }
 0x7ff   :  { %772 = vsyncpa [#allocation3], 1 }

</bundles_post_ra>
